<compile_context>
chip_gen: v5e
topology: v5e:2x2
jax: 0.10.0
libtpu: 0.0.40
codegen_flags: <defaults>
</compile_context>

<pallas_src>
import functools

import jax
import jax.numpy as jnp
from jax.experimental import pallas as pl
from jax.experimental.pallas import tpu as pltpu

# ---------------- config (mirrors the args.* fields LSTM_CUBE expects) --------
ATTITUDE_DIM = 8
HIDDEN_SIZE = 32
LSTM_LAYERS = 1          # fused kernel assumes a single LSTM layer
BIDIRECTIONAL = True
NUM_DIRECTIONS = 2 if BIDIRECTIONAL else 1
LABEL_SIZE = 4
BATCH = 2
SEQ = 8
MLP_HIDDEN = 256

# ---------------- packed weight-slab layout (compile-time constants) ----------
_G = 4 * HIDDEN_SIZE                          # 128 gate lanes per direction


def _round_up(x, m):
    return (x + m - 1) // m * m


SLAB_COLS = max(2 * _G, MLP_HIDDEN)           # 256 (both are 256 here)
R_WIH = 0                                     # rows 0..D-1   : [wih_f | wih_b]   (D, 2G)
R_BIAS = _round_up(ATTITUDE_DIM, 8)           # row 8: b_all, row 9: b1, row 10: b3
R_WHH = _round_up(R_BIAS + 3, 16)             # rows 16..47   : whh_f             (H, G)
R_W1 = _round_up(R_WHH + HIDDEN_SIZE, 16)     # rows 48..111  : w1^T              (2H, 256)
R_W3 = _round_up(R_W1 + 2 * HIDDEN_SIZE, 16)  # rows 112..115 : w3 (L, 256)
SLAB_ROWS = _round_up(R_W3 + LABEL_SIZE, 16)  # 128


# ------------------------------ fused forward kernel --------------------------
def _lstm_cube_kernel(x_ref, slab_ref, out_ref, *, batch, seq):
    # x_ref:    (B, S, D) f32 attitude input (passed untouched from the caller)
    # slab_ref: (SLAB_ROWS, SLAB_COLS) bf16 packed weights (layout above)
    # out_ref:  (1, L) f32 log-softmax output
    B, S = batch, seq
    H, D, L, MH, G = HIDDEN_SIZE, ATTITUDE_DIM, LABEL_SIZE, MLP_HIDDEN, _G
    f32, bf16 = jnp.float32, jnp.bfloat16

    # ---- static carve of the packed slab (aligned loads, no relayout) --------
    wih_all = slab_ref[R_WIH:R_WIH + D, 0:2 * G]                     # (D, 2G)  bf16
    whh = slab_ref[R_WHH:R_WHH + H, 0:G]                             # (H, G)   bf16
    w1a = slab_ref[R_W1:R_W1 + H, 0:MH]                              # (H, MH)  bf16
    w1b = slab_ref[R_W1 + H:R_W1 + 2 * H, 0:MH]                      # (H, MH)  bf16
    w3t = slab_ref[R_W3:R_W3 + L, 0:MH]                              # (L, MH)  bf16
    b_all = slab_ref[R_BIAS:R_BIAS + 1, 0:2 * G].astype(f32)         # (1, 2G)
    b1 = slab_ref[R_BIAS + 1:R_BIAS + 2, 0:MH].astype(f32)           # (1, MH)
    b3 = slab_ref[R_BIAS + 2:R_BIAS + 3, 0:MH].astype(f32)[:, 0:L]   # (1, L)

    # ---- only batch row B-1 feeds out[-1][-1] ---------------------------------
    x = x_ref[B - 1, :, :].astype(bf16)                              # (S, D)

    # ---- fused fwd+bwd input projection: ONE MXU op over the sequence --------
    xp = jnp.dot(x, wih_all, preferred_element_type=f32) + b_all     # (S, 2G) f32

    # ---- forward recurrence (single row state), fully unrolled ----------------
    h = jnp.zeros((1, H), f32)
    c = jnp.zeros((1, H), f32)
    for t in range(S):
        gates = xp[t:t + 1, 0:G] + jnp.dot(
            h.astype(bf16), whh, preferred_element_type=f32)         # (1, G) f32
        sg = jax.nn.sigmoid(gates)       # one EUP pass over the whole gates vreg
        tg = jnp.tanh(gates)             # one EUP pass over the whole gates vreg
        c = sg[:, H:2 * H] * c + sg[:, 0:H] * tg[:, 2 * H:3 * H]     # f*c + i*g
        h = sg[:, 3 * H:4 * H] * jnp.tanh(c)                         # o*tanh(c)
    h_fwd = h                                                        # (1, H)

    # ---- backward direction: only its first step (seq index S-1) is consumed --
    # h_prev = c_prev = 0, so the W_hh term and the forget-gate term drop out.
    gb = xp[S - 1:S, G:2 * G]                                        # (1, G) f32
    sb = jax.nn.sigmoid(gb)
    tb = jnp.tanh(gb)
    h_bwd = sb[:, 3 * H:4 * H] * jnp.tanh(sb[:, 0:H] * tb[:, 2 * H:3 * H])

    # ---- MLP head on the single surviving row ---------------------------------
    # feat = [h_fwd | h_bwd]; split matmul avoids a lane concat:
    pre = (jnp.dot(h_fwd.astype(bf16), w1a, preferred_element_type=f32)
           + jnp.dot(h_bwd.astype(bf16), w1b, preferred_element_type=f32)
           + b1)                                                     # (1, 256)
    hid = jnp.tanh(pre)
    # logits = hid @ w3^T  (rhs stored row-major as (L, 256); contract on dim 1)
    logits = jax.lax.dot_general(
        hid.astype(bf16), w3t, (((1,), (1,)), ((), ())),
        preferred_element_type=f32) + b3                             # (1, L)

    # ---- log_softmax -----------------------------------------------------------
    z = logits - jnp.max(logits, axis=-1, keepdims=True)
    out_ref[...] = z - jnp.log(jnp.sum(jnp.exp(z), axis=-1, keepdims=True))


def lstm_cube_forward(attitude_input, prep):
    """Matches LSTM_CUBE.forward: returns (1, label_size) log-probs."""
    B, S, _ = attitude_input.shape
    kernel = functools.partial(_lstm_cube_kernel, batch=B, seq=S)
    return pl.pallas_call(
        kernel,
        out_shape=jax.ShapeDtypeStruct((1, LABEL_SIZE), jnp.float32),
        in_specs=[pl.BlockSpec(memory_space=pltpu.MemorySpace.VMEM)] * 2,
        out_specs=pl.BlockSpec(memory_space=pltpu.MemorySpace.VMEM),
    )(attitude_input, prep["slab"])


# ------------------------------ params ----------------------------------------
def init_params(key):
    """PyTorch-shaped parameters, matching nn.LSTM / LSTM_CUBE._init_weights."""
    H = HIDDEN_SIZE
    params = {"lstm": {}}
    bound = 1.0 / (H ** 0.5)
    for layer in range(LSTM_LAYERS):
        in_dim = ATTITUDE_DIM if layer == 0 else H * NUM_DIRECTIONS
        for d in range(NUM_DIRECTIONS):
            key, k1, k2, k3, k4 = jax.random.split(key, 5)
            params["lstm"][(layer, d)] = (
                jax.random.uniform(k1, (4 * H, in_dim), jnp.float32, -bound, bound),
                jax.random.uniform(k2, (4 * H, H), jnp.float32, -bound, bound),
                jax.random.uniform(k3, (4 * H,), jnp.float32, -bound, bound),
                jax.random.uniform(k4, (4 * H,), jnp.float32, -bound, bound),
            )
    feat = H * NUM_DIRECTIONS
    key, k1, k2, k3 = jax.random.split(key, 4)
    # logistic1: uniform(-1, 1) weights, zero bias (per _init_weights)
    params["w1"] = jax.random.uniform(k1, (MLP_HIDDEN, feat), jnp.float32, -1.0, 1.0)
    params["b1"] = jnp.zeros((MLP_HIDDEN,), jnp.float32)
    # logistic3: default nn.Linear init scale
    b3 = 1.0 / (MLP_HIDDEN ** 0.5)
    params["w3"] = jax.random.uniform(k2, (LABEL_SIZE, MLP_HIDDEN), jnp.float32, -b3, b3)
    params["b3"] = jax.random.uniform(k3, (LABEL_SIZE,), jnp.float32, -b3, b3)
    return params


def prepare_params(params):
    """One-time layout prep: fold b_ih+b_hh, pre-transpose all weights so the
    gate/feature axis is the lane axis, and pack EVERYTHING into a single bf16
    (SLAB_ROWS, SLAB_COLS) slab so the kernel issues exactly one weight DMA."""
    H, D, L, G = HIDDEN_SIZE, ATTITUDE_DIM, LABEL_SIZE, _G
    w_ih_f, w_hh_f, b_ih_f, b_hh_f = params["lstm"][(0, 0)]
    w_ih_b, _w_hh_b, b_ih_b, b_hh_b = params["lstm"][(0, 1)]   # whh_b unused (zero-state first step only)

    slab = jnp.zeros((SLAB_ROWS, SLAB_COLS), jnp.float32)
    wih_all = jnp.concatenate([w_ih_f.T, w_ih_b.T], axis=1)          # (D, 2G)
    b_all = jnp.concatenate([b_ih_f + b_hh_f, b_ih_b + b_hh_b])      # (2G,)
    slab = slab.at[R_WIH:R_WIH + D, 0:2 * G].set(wih_all)
    slab = slab.at[R_BIAS, 0:2 * G].set(b_all)
    slab = slab.at[R_BIAS + 1, 0:MLP_HIDDEN].set(params["b1"])
    slab = slab.at[R_BIAS + 2, 0:L].set(params["b3"])
    slab = slab.at[R_WHH:R_WHH + H, 0:G].set(w_hh_f.T)               # (H, G)
    slab = slab.at[R_W1:R_W1 + 2 * H, 0:MLP_HIDDEN].set(params["w1"].T)  # (2H, 256)
    slab = slab.at[R_W3:R_W3 + L, 0:MLP_HIDDEN].set(params["w3"])    # (L, 256)
    return {"slab": slab.astype(jnp.bfloat16)}


# ------------------------------ pure-JAX reference ----------------------------
def _reference_forward(x, params):
    B, S, _ = x.shape
    H = HIDDEN_SIZE

    def run_dir(xs, w_ih, w_hh, b_ih, b_hh):
        h = jnp.zeros((B, H), jnp.float32)
        c = jnp.zeros((B, H), jnp.float32)
        outs = []
        for t in range(xs.shape[1]):
            g = xs[:, t, :] @ w_ih.T + h @ w_hh.T + b_ih + b_hh
            i = jax.nn.sigmoid(g[:, :H])
            f = jax.nn.sigmoid(g[:, H:2 * H])
            gg = jnp.tanh(g[:, 2 * H:3 * H])
            o = jax.nn.sigmoid(g[:, 3 * H:])
            c = f * c + i * gg
            h = o * jnp.tanh(c)
            outs.append(h)
        return jnp.stack(outs, axis=1)                       # (B, S, H)

    fwd = run_dir(x, *params["lstm"][(0, 0)])
    bwd = run_dir(x[:, ::-1, :], *params["lstm"][(0, 1)])[:, ::-1, :]
    out = jnp.concatenate([fwd, bwd], axis=-1)               # (B, S, 2H)
    hid = jnp.tanh(out @ params["w1"].T + params["b1"])
    logits = (hid @ params["w3"].T + params["b3"])[-1, -1]
    return jax.nn.log_softmax(logits.reshape(1, -1), axis=-1)


# ------------------------------ main -------------------------------------------
if __name__ == "__main__":
    key = jax.random.PRNGKey(0)
    pkey, xkey = jax.random.split(key)
    params = init_params(pkey)
    prep = prepare_params(params)

    attitude_input = jax.random.normal(
        xkey, (BATCH, SEQ, ATTITUDE_DIM), dtype=jnp.float32
    )

    fwd = jax.jit(lambda a: lstm_cube_forward(a, prep))
    out = jax.block_until_ready(fwd(attitude_input))

    assert out.shape == (1, LABEL_SIZE)
    assert bool(jnp.isfinite(out).all())

    ref = _reference_forward(attitude_input, params)
    assert bool(jnp.allclose(out, ref, atol=5e-2, rtol=5e-2)), (out, ref)

    print("KERNEL_OK")
</pallas_src>

<mosaic_0001>
module attributes {stable_mosaic.version = 11 : i64} {
  func.func @_lstm_cube_kernel(%arg0: memref<2x8x8xf32, #tpu.memory_space<vmem>>, %arg1: memref<128x256xbf16, #tpu.memory_space<vmem>>, %arg2: memref<1x4xf32, #tpu.memory_space<vmem>>) attributes {dimension_semantics = [], scalar_prefetch = 0 : i64, scratch_operands = 0 : i64, tpu.core_type = #tpu.core_type<tc>} {
    %c0 = arith.constant 0 : index
    %c0_0 = arith.constant 0 : index
    %0 = vector.load %arg1[%c0, %c0_0] : memref<128x256xbf16, #tpu.memory_space<vmem>>, vector<8x256xbf16>
    %c16 = arith.constant 16 : index
    %c0_1 = arith.constant 0 : index
    %1 = vector.load %arg1[%c16, %c0_1] : memref<128x256xbf16, #tpu.memory_space<vmem>>, vector<32x128xbf16>
    %c48 = arith.constant 48 : index
    %c0_2 = arith.constant 0 : index
    %2 = vector.load %arg1[%c48, %c0_2] : memref<128x256xbf16, #tpu.memory_space<vmem>>, vector<32x256xbf16>
    %c80 = arith.constant 80 : index
    %c0_3 = arith.constant 0 : index
    %3 = vector.load %arg1[%c80, %c0_3] : memref<128x256xbf16, #tpu.memory_space<vmem>>, vector<32x256xbf16>
    %c112 = arith.constant 112 : index
    %c0_4 = arith.constant 0 : index
    %4 = vector.load %arg1[%c112, %c0_4] : memref<128x256xbf16, #tpu.memory_space<vmem>>, vector<4x256xbf16>
    %c8 = arith.constant 8 : index
    %c0_5 = arith.constant 0 : index
    %5 = vector.load %arg1[%c8, %c0_5] : memref<128x256xbf16, #tpu.memory_space<vmem>>, vector<1x256xbf16>
    %6 = arith.extf %5 : vector<1x256xbf16> to vector<1x256xf32>
    %c9 = arith.constant 9 : index
    %c0_6 = arith.constant 0 : index
    %7 = vector.load %arg1[%c9, %c0_6] : memref<128x256xbf16, #tpu.memory_space<vmem>>, vector<1x256xbf16>
    %8 = arith.extf %7 : vector<1x256xbf16> to vector<1x256xf32>
    %c10 = arith.constant 10 : index
    %c0_7 = arith.constant 0 : index
    %9 = vector.load %arg1[%c10, %c0_7] : memref<128x256xbf16, #tpu.memory_space<vmem>>, vector<1x256xbf16>
    %10 = arith.extf %9 : vector<1x256xbf16> to vector<1x256xf32>
    %11 = vector.extract_strided_slice %10 {offsets = [0, 0], sizes = [1, 4], strides = [1, 1]} : vector<1x256xf32> to vector<1x4xf32>
    %c1 = arith.constant 1 : index
    %c0_8 = arith.constant 0 : index
    %c0_9 = arith.constant 0 : index
    %12 = vector.load %arg0[%c1, %c0_8, %c0_9] : memref<2x8x8xf32, #tpu.memory_space<vmem>>, vector<1x8x8xf32>
    %13 = vector.shape_cast %12 : vector<1x8x8xf32> to vector<8x8xf32>
    %14 = arith.truncf %13 : vector<8x8xf32> to vector<8x8xbf16>
    %cst = arith.constant dense<0.000000e+00> : vector<8x256xf32>
    %15 = tpu.matmul %14, %0, %cst {dimension_numbers = #tpu.dot_dimension_numbers<[1], [0], [0], [1], [0, 0, 1, 1], [], []>} : vector<8x8xbf16>, vector<8x256xbf16>, vector<8x256xf32> -> vector<8x256xf32>
    %16 = vector.broadcast %6 : vector<1x256xf32> to vector<8x256xf32>
    %17 = arith.addf %15, %16 : vector<8x256xf32>
    %cst_10 = arith.constant 0.000000e+00 : f32
    %18 = vector.broadcast %cst_10 : f32 to vector<1x32xf32>
    %cst_11 = arith.constant 0.000000e+00 : f32
    %19 = vector.broadcast %cst_11 : f32 to vector<1x32xf32>
    %20 = vector.extract_strided_slice %17 {offsets = [0, 0], sizes = [1, 128], strides = [1, 1]} : vector<8x256xf32> to vector<1x128xf32>
    %21 = arith.truncf %18 : vector<1x32xf32> to vector<1x32xbf16>
    %cst_12 = arith.constant dense<0.000000e+00> : vector<1x128xf32>
    %22 = tpu.matmul %21, %1, %cst_12 {dimension_numbers = #tpu.dot_dimension_numbers<[1], [0], [0], [1], [0, 0, 1, 1], [], []>} : vector<1x32xbf16>, vector<32x128xbf16>, vector<1x128xf32> -> vector<1x128xf32>
    %23 = arith.addf %20, %22 : vector<1x128xf32>
    %24 = arith.negf %23 : vector<1x128xf32>
    %25 = math.exp %24 : vector<1x128xf32>
    %cst_13 = arith.constant 1.000000e+00 : f32
    %26 = vector.broadcast %cst_13 : f32 to vector<1x128xf32>
    %27 = arith.addf %26, %25 : vector<1x128xf32>
    %28 = arith.divf %26, %27 : vector<1x128xf32>
    %29 = math.tanh %23 : vector<1x128xf32>
    %30 = vector.extract_strided_slice %28 {offsets = [0, 32], sizes = [1, 32], strides = [1, 1]} : vector<1x128xf32> to vector<1x32xf32>
    %31 = arith.mulf %30, %19 : vector<1x32xf32>
    %32 = vector.extract_strided_slice %28 {offsets = [0, 0], sizes = [1, 32], strides = [1, 1]} : vector<1x128xf32> to vector<1x32xf32>
    %33 = vector.extract_strided_slice %29 {offsets = [0, 64], sizes = [1, 32], strides = [1, 1]} : vector<1x128xf32> to vector<1x32xf32>
    %34 = arith.mulf %32, %33 : vector<1x32xf32>
    %35 = arith.addf %31, %34 : vector<1x32xf32>
    %36 = vector.extract_strided_slice %28 {offsets = [0, 96], sizes = [1, 32], strides = [1, 1]} : vector<1x128xf32> to vector<1x32xf32>
    %37 = math.tanh %35 : vector<1x32xf32>
    %38 = arith.mulf %36, %37 : vector<1x32xf32>
    %39 = vector.extract_strided_slice %17 {offsets = [1, 0], sizes = [1, 128], strides = [1, 1]} : vector<8x256xf32> to vector<1x128xf32>
    %40 = arith.truncf %38 : vector<1x32xf32> to vector<1x32xbf16>
    %cst_14 = arith.constant dense<0.000000e+00> : vector<1x128xf32>
    %41 = tpu.matmul %40, %1, %cst_14 {dimension_numbers = #tpu.dot_dimension_numbers<[1], [0], [0], [1], [0, 0, 1, 1], [], []>} : vector<1x32xbf16>, vector<32x128xbf16>, vector<1x128xf32> -> vector<1x128xf32>
    %42 = arith.addf %39, %41 : vector<1x128xf32>
    %43 = arith.negf %42 : vector<1x128xf32>
    %44 = math.exp %43 : vector<1x128xf32>
    %cst_15 = arith.constant 1.000000e+00 : f32
    %45 = vector.broadcast %cst_15 : f32 to vector<1x128xf32>
    %46 = arith.addf %45, %44 : vector<1x128xf32>
    %47 = arith.divf %45, %46 : vector<1x128xf32>
    %48 = math.tanh %42 : vector<1x128xf32>
    %49 = vector.extract_strided_slice %47 {offsets = [0, 32], sizes = [1, 32], strides = [1, 1]} : vector<1x128xf32> to vector<1x32xf32>
    %50 = arith.mulf %49, %35 : vector<1x32xf32>
    %51 = vector.extract_strided_slice %47 {offsets = [0, 0], sizes = [1, 32], strides = [1, 1]} : vector<1x128xf32> to vector<1x32xf32>
    %52 = vector.extract_strided_slice %48 {offsets = [0, 64], sizes = [1, 32], strides = [1, 1]} : vector<1x128xf32> to vector<1x32xf32>
    %53 = arith.mulf %51, %52 : vector<1x32xf32>
    %54 = arith.addf %50, %53 : vector<1x32xf32>
    %55 = vector.extract_strided_slice %47 {offsets = [0, 96], sizes = [1, 32], strides = [1, 1]} : vector<1x128xf32> to vector<1x32xf32>
    %56 = math.tanh %54 : vector<1x32xf32>
    %57 = arith.mulf %55, %56 : vector<1x32xf32>
    %58 = vector.extract_strided_slice %17 {offsets = [2, 0], sizes = [1, 128], strides = [1, 1]} : vector<8x256xf32> to vector<1x128xf32>
    %59 = arith.truncf %57 : vector<1x32xf32> to vector<1x32xbf16>
    %cst_16 = arith.constant dense<0.000000e+00> : vector<1x128xf32>
    %60 = tpu.matmul %59, %1, %cst_16 {dimension_numbers = #tpu.dot_dimension_numbers<[1], [0], [0], [1], [0, 0, 1, 1], [], []>} : vector<1x32xbf16>, vector<32x128xbf16>, vector<1x128xf32> -> vector<1x128xf32>
    %61 = arith.addf %58, %60 : vector<1x128xf32>
    %62 = arith.negf %61 : vector<1x128xf32>
    %63 = math.exp %62 : vector<1x128xf32>
    %cst_17 = arith.constant 1.000000e+00 : f32
    %64 = vector.broadcast %cst_17 : f32 to vector<1x128xf32>
    %65 = arith.addf %64, %63 : vector<1x128xf32>
    %66 = arith.divf %64, %65 : vector<1x128xf32>
    %67 = math.tanh %61 : vector<1x128xf32>
    %68 = vector.extract_strided_slice %66 {offsets = [0, 32], sizes = [1, 32], strides = [1, 1]} : vector<1x128xf32> to vector<1x32xf32>
    %69 = arith.mulf %68, %54 : vector<1x32xf32>
    %70 = vector.extract_strided_slice %66 {offsets = [0, 0], sizes = [1, 32], strides = [1, 1]} : vector<1x128xf32> to vector<1x32xf32>
    %71 = vector.extract_strided_slice %67 {offsets = [0, 64], sizes = [1, 32], strides = [1, 1]} : vector<1x128xf32> to vector<1x32xf32>
    %72 = arith.mulf %70, %71 : vector<1x32xf32>
    %73 = arith.addf %69, %72 : vector<1x32xf32>
    %74 = vector.extract_strided_slice %66 {offsets = [0, 96], sizes = [1, 32], strides = [1, 1]} : vector<1x128xf32> to vector<1x32xf32>
    %75 = math.tanh %73 : vector<1x32xf32>
    %76 = arith.mulf %74, %75 : vector<1x32xf32>
    %77 = vector.extract_strided_slice %17 {offsets = [3, 0], sizes = [1, 128], strides = [1, 1]} : vector<8x256xf32> to vector<1x128xf32>
    %78 = arith.truncf %76 : vector<1x32xf32> to vector<1x32xbf16>
    %cst_18 = arith.constant dense<0.000000e+00> : vector<1x128xf32>
    %79 = tpu.matmul %78, %1, %cst_18 {dimension_numbers = #tpu.dot_dimension_numbers<[1], [0], [0], [1], [0, 0, 1, 1], [], []>} : vector<1x32xbf16>, vector<32x128xbf16>, vector<1x128xf32> -> vector<1x128xf32>
    %80 = arith.addf %77, %79 : vector<1x128xf32>
    %81 = arith.negf %80 : vector<1x128xf32>
    %82 = math.exp %81 : vector<1x128xf32>
    %cst_19 = arith.constant 1.000000e+00 : f32
    %83 = vector.broadcast %cst_19 : f32 to vector<1x128xf32>
    %84 = arith.addf %83, %82 : vector<1x128xf32>
    %85 = arith.divf %83, %84 : vector<1x128xf32>
    %86 = math.tanh %80 : vector<1x128xf32>
    %87 = vector.extract_strided_slice %85 {offsets = [0, 32], sizes = [1, 32], strides = [1, 1]} : vector<1x128xf32> to vector<1x32xf32>
    %88 = arith.mulf %87, %73 : vector<1x32xf32>
    %89 = vector.extract_strided_slice %85 {offsets = [0, 0], sizes = [1, 32], strides = [1, 1]} : vector<1x128xf32> to vector<1x32xf32>
    %90 = vector.extract_strided_slice %86 {offsets = [0, 64], sizes = [1, 32], strides = [1, 1]} : vector<1x128xf32> to vector<1x32xf32>
    %91 = arith.mulf %89, %90 : vector<1x32xf32>
    %92 = arith.addf %88, %91 : vector<1x32xf32>
    %93 = vector.extract_strided_slice %85 {offsets = [0, 96], sizes = [1, 32], strides = [1, 1]} : vector<1x128xf32> to vector<1x32xf32>
    %94 = math.tanh %92 : vector<1x32xf32>
    %95 = arith.mulf %93, %94 : vector<1x32xf32>
    %96 = vector.extract_strided_slice %17 {offsets = [4, 0], sizes = [1, 128], strides = [1, 1]} : vector<8x256xf32> to vector<1x128xf32>
    %97 = arith.truncf %95 : vector<1x32xf32> to vector<1x32xbf16>
    %cst_20 = arith.constant dense<0.000000e+00> : vector<1x128xf32>
    %98 = tpu.matmul %97, %1, %cst_20 {dimension_numbers = #tpu.dot_dimension_numbers<[1], [0], [0], [1], [0, 0, 1, 1], [], []>} : vector<1x32xbf16>, vector<32x128xbf16>, vector<1x128xf32> -> vector<1x128xf32>
    %99 = arith.addf %96, %98 : vector<1x128xf32>
    %100 = arith.negf %99 : vector<1x128xf32>
    %101 = math.exp %100 : vector<1x128xf32>
    %cst_21 = arith.constant 1.000000e+00 : f32
    %102 = vector.broadcast %cst_21 : f32 to vector<1x128xf32>
    %103 = arith.addf %102, %101 : vector<1x128xf32>
    %104 = arith.divf %102, %103 : vector<1x128xf32>
    %105 = math.tanh %99 : vector<1x128xf32>
    %106 = vector.extract_strided_slice %104 {offsets = [0, 32], sizes = [1, 32], strides = [1, 1]} : vector<1x128xf32> to vector<1x32xf32>
    %107 = arith.mulf %106, %92 : vector<1x32xf32>
    %108 = vector.extract_strided_slice %104 {offsets = [0, 0], sizes = [1, 32], strides = [1, 1]} : vector<1x128xf32> to vector<1x32xf32>
    %109 = vector.extract_strided_slice %105 {offsets = [0, 64], sizes = [1, 32], strides = [1, 1]} : vector<1x128xf32> to vector<1x32xf32>
    %110 = arith.mulf %108, %109 : vector<1x32xf32>
    %111 = arith.addf %107, %110 : vector<1x32xf32>
    %112 = vector.extract_strided_slice %104 {offsets = [0, 96], sizes = [1, 32], strides = [1, 1]} : vector<1x128xf32> to vector<1x32xf32>
    %113 = math.tanh %111 : vector<1x32xf32>
    %114 = arith.mulf %112, %113 : vector<1x32xf32>
    %115 = vector.extract_strided_slice %17 {offsets = [5, 0], sizes = [1, 128], strides = [1, 1]} : vector<8x256xf32> to vector<1x128xf32>
    %116 = arith.truncf %114 : vector<1x32xf32> to vector<1x32xbf16>
    %cst_22 = arith.constant dense<0.000000e+00> : vector<1x128xf32>
    %117 = tpu.matmul %116, %1, %cst_22 {dimension_numbers = #tpu.dot_dimension_numbers<[1], [0], [0], [1], [0, 0, 1, 1], [], []>} : vector<1x32xbf16>, vector<32x128xbf16>, vector<1x128xf32> -> vector<1x128xf32>
    %118 = arith.addf %115, %117 : vector<1x128xf32>
    %119 = arith.negf %118 : vector<1x128xf32>
    %120 = math.exp %119 : vector<1x128xf32>
    %cst_23 = arith.constant 1.000000e+00 : f32
    %121 = vector.broadcast %cst_23 : f32 to vector<1x128xf32>
    %122 = arith.addf %121, %120 : vector<1x128xf32>
    %123 = arith.divf %121, %122 : vector<1x128xf32>
    %124 = math.tanh %118 : vector<1x128xf32>
    %125 = vector.extract_strided_slice %123 {offsets = [0, 32], sizes = [1, 32], strides = [1, 1]} : vector<1x128xf32> to vector<1x32xf32>
    %126 = arith.mulf %125, %111 : vector<1x32xf32>
    %127 = vector.extract_strided_slice %123 {offsets = [0, 0], sizes = [1, 32], strides = [1, 1]} : vector<1x128xf32> to vector<1x32xf32>
    %128 = vector.extract_strided_slice %124 {offsets = [0, 64], sizes = [1, 32], strides = [1, 1]} : vector<1x128xf32> to vector<1x32xf32>
    %129 = arith.mulf %127, %128 : vector<1x32xf32>
    %130 = arith.addf %126, %129 : vector<1x32xf32>
    %131 = vector.extract_strided_slice %123 {offsets = [0, 96], sizes = [1, 32], strides = [1, 1]} : vector<1x128xf32> to vector<1x32xf32>
    %132 = math.tanh %130 : vector<1x32xf32>
    %133 = arith.mulf %131, %132 : vector<1x32xf32>
    %134 = vector.extract_strided_slice %17 {offsets = [6, 0], sizes = [1, 128], strides = [1, 1]} : vector<8x256xf32> to vector<1x128xf32>
    %135 = arith.truncf %133 : vector<1x32xf32> to vector<1x32xbf16>
    %cst_24 = arith.constant dense<0.000000e+00> : vector<1x128xf32>
    %136 = tpu.matmul %135, %1, %cst_24 {dimension_numbers = #tpu.dot_dimension_numbers<[1], [0], [0], [1], [0, 0, 1, 1], [], []>} : vector<1x32xbf16>, vector<32x128xbf16>, vector<1x128xf32> -> vector<1x128xf32>
    %137 = arith.addf %134, %136 : vector<1x128xf32>
    %138 = arith.negf %137 : vector<1x128xf32>
    %139 = math.exp %138 : vector<1x128xf32>
    %cst_25 = arith.constant 1.000000e+00 : f32
    %140 = vector.broadcast %cst_25 : f32 to vector<1x128xf32>
    %141 = arith.addf %140, %139 : vector<1x128xf32>
    %142 = arith.divf %140, %141 : vector<1x128xf32>
    %143 = math.tanh %137 : vector<1x128xf32>
    %144 = vector.extract_strided_slice %142 {offsets = [0, 32], sizes = [1, 32], strides = [1, 1]} : vector<1x128xf32> to vector<1x32xf32>
    %145 = arith.mulf %144, %130 : vector<1x32xf32>
    %146 = vector.extract_strided_slice %142 {offsets = [0, 0], sizes = [1, 32], strides = [1, 1]} : vector<1x128xf32> to vector<1x32xf32>
    %147 = vector.extract_strided_slice %143 {offsets = [0, 64], sizes = [1, 32], strides = [1, 1]} : vector<1x128xf32> to vector<1x32xf32>
    %148 = arith.mulf %146, %147 : vector<1x32xf32>
    %149 = arith.addf %145, %148 : vector<1x32xf32>
    %150 = vector.extract_strided_slice %142 {offsets = [0, 96], sizes = [1, 32], strides = [1, 1]} : vector<1x128xf32> to vector<1x32xf32>
    %151 = math.tanh %149 : vector<1x32xf32>
    %152 = arith.mulf %150, %151 : vector<1x32xf32>
    %153 = vector.extract_strided_slice %17 {offsets = [7, 0], sizes = [1, 128], strides = [1, 1]} : vector<8x256xf32> to vector<1x128xf32>
    %154 = arith.truncf %152 : vector<1x32xf32> to vector<1x32xbf16>
    %cst_26 = arith.constant dense<0.000000e+00> : vector<1x128xf32>
    %155 = tpu.matmul %154, %1, %cst_26 {dimension_numbers = #tpu.dot_dimension_numbers<[1], [0], [0], [1], [0, 0, 1, 1], [], []>} : vector<1x32xbf16>, vector<32x128xbf16>, vector<1x128xf32> -> vector<1x128xf32>
    %156 = arith.addf %153, %155 : vector<1x128xf32>
    %157 = arith.negf %156 : vector<1x128xf32>
    %158 = math.exp %157 : vector<1x128xf32>
    %cst_27 = arith.constant 1.000000e+00 : f32
    %159 = vector.broadcast %cst_27 : f32 to vector<1x128xf32>
    %160 = arith.addf %159, %158 : vector<1x128xf32>
    %161 = arith.divf %159, %160 : vector<1x128xf32>
    %162 = math.tanh %156 : vector<1x128xf32>
    %163 = vector.extract_strided_slice %161 {offsets = [0, 32], sizes = [1, 32], strides = [1, 1]} : vector<1x128xf32> to vector<1x32xf32>
    %164 = arith.mulf %163, %149 : vector<1x32xf32>
    %165 = vector.extract_strided_slice %161 {offsets = [0, 0], sizes = [1, 32], strides = [1, 1]} : vector<1x128xf32> to vector<1x32xf32>
    %166 = vector.extract_strided_slice %162 {offsets = [0, 64], sizes = [1, 32], strides = [1, 1]} : vector<1x128xf32> to vector<1x32xf32>
    %167 = arith.mulf %165, %166 : vector<1x32xf32>
    %168 = arith.addf %164, %167 : vector<1x32xf32>
    %169 = vector.extract_strided_slice %161 {offsets = [0, 96], sizes = [1, 32], strides = [1, 1]} : vector<1x128xf32> to vector<1x32xf32>
    %170 = math.tanh %168 : vector<1x32xf32>
    %171 = arith.mulf %169, %170 : vector<1x32xf32>
    %172 = vector.extract_strided_slice %17 {offsets = [7, 128], sizes = [1, 128], strides = [1, 1]} : vector<8x256xf32> to vector<1x128xf32>
    %173 = arith.negf %172 : vector<1x128xf32>
    %174 = math.exp %173 : vector<1x128xf32>
    %cst_28 = arith.constant 1.000000e+00 : f32
    %175 = vector.broadcast %cst_28 : f32 to vector<1x128xf32>
    %176 = arith.addf %175, %174 : vector<1x128xf32>
    %177 = arith.divf %175, %176 : vector<1x128xf32>
    %178 = math.tanh %172 : vector<1x128xf32>
    %179 = vector.extract_strided_slice %177 {offsets = [0, 96], sizes = [1, 32], strides = [1, 1]} : vector<1x128xf32> to vector<1x32xf32>
    %180 = vector.extract_strided_slice %177 {offsets = [0, 0], sizes = [1, 32], strides = [1, 1]} : vector<1x128xf32> to vector<1x32xf32>
    %181 = vector.extract_strided_slice %178 {offsets = [0, 64], sizes = [1, 32], strides = [1, 1]} : vector<1x128xf32> to vector<1x32xf32>
    %182 = arith.mulf %180, %181 : vector<1x32xf32>
    %183 = math.tanh %182 : vector<1x32xf32>
    %184 = arith.mulf %179, %183 : vector<1x32xf32>
    %185 = arith.truncf %171 : vector<1x32xf32> to vector<1x32xbf16>
    %cst_29 = arith.constant dense<0.000000e+00> : vector<1x256xf32>
    %186 = tpu.matmul %185, %2, %cst_29 {dimension_numbers = #tpu.dot_dimension_numbers<[1], [0], [0], [1], [0, 0, 1, 1], [], []>} : vector<1x32xbf16>, vector<32x256xbf16>, vector<1x256xf32> -> vector<1x256xf32>
    %187 = arith.truncf %184 : vector<1x32xf32> to vector<1x32xbf16>
    %cst_30 = arith.constant dense<0.000000e+00> : vector<1x256xf32>
    %188 = tpu.matmul %187, %3, %cst_30 {dimension_numbers = #tpu.dot_dimension_numbers<[1], [0], [0], [1], [0, 0, 1, 1], [], []>} : vector<1x32xbf16>, vector<32x256xbf16>, vector<1x256xf32> -> vector<1x256xf32>
    %189 = arith.addf %186, %188 : vector<1x256xf32>
    %190 = arith.addf %189, %8 : vector<1x256xf32>
    %191 = math.tanh %190 : vector<1x256xf32>
    %192 = arith.truncf %191 : vector<1x256xf32> to vector<1x256xbf16>
    %cst_31 = arith.constant dense<0.000000e+00> : vector<1x4xf32>
    %193 = tpu.matmul %192, %4, %cst_31 {dimension_numbers = #tpu.dot_dimension_numbers<[1], [1], [0], [0], [0, 0, 1, 0], [], []>} : vector<1x256xbf16>, vector<4x256xbf16>, vector<1x4xf32> -> vector<1x4xf32>
    %194 = arith.addf %193, %11 : vector<1x4xf32>
    %cst_32 = arith.constant dense<0xFF800000> : vector<1xf32>
    %195 = vector.multi_reduction <maximumf>, %194, %cst_32 [1] : vector<1x4xf32> to vector<1xf32>
    %196 = vector.shape_cast %195 : vector<1xf32> to vector<1x1xf32>
    %197 = vector.broadcast %196 : vector<1x1xf32> to vector<1x4xf32>
    %198 = arith.subf %194, %197 : vector<1x4xf32>
    %199 = math.exp %198 : vector<1x4xf32>
    %cst_33 = arith.constant dense<0.000000e+00> : vector<1xf32>
    %200 = vector.multi_reduction <add>, %199, %cst_33 [1] : vector<1x4xf32> to vector<1xf32>
    %201 = vector.shape_cast %200 : vector<1xf32> to vector<1x1xf32>
    %202 = math.log %201 : vector<1x1xf32>
    %203 = vector.broadcast %202 : vector<1x1xf32> to vector<1x4xf32>
    %204 = arith.subf %198, %203 : vector<1x4xf32>
    %c0_34 = arith.constant 0 : index
    %c0_35 = arith.constant 0 : index
    %205 = vector.load %arg2[%c0_34, %c0_35] : memref<1x4xf32, #tpu.memory_space<vmem>>, vector<1x4xf32>
    tpu.vector_store %arg2[%c0_34, %c0_35], %204 {strides = array<i32>} : memref<1x4xf32, #tpu.memory_space<vmem>>, vector<1x4xf32>,
    return
  }
}

</mosaic_0001>

<bundles_post_ra>
// kernel: _lambda_.1
= control target key start
LH: loop header
LB: loop body
LE: loop exit
PB: predicated region body
PF: predicated region fallthrough
CT: control target
= control target key end

     0   :  { %7 = vsyncpa [#allocation3], 0  ;;  %s1241_s0 = inlined_call_operand.hbm [shape: f32[2,8,8], index: 0, kind: input, shape index: {}]   ;;  %s1242_s1 = inlined_call_operand.hbm [shape: bf16[128,256], index: 1, kind: input, shape index: {}]   ;;  %s1243_s2 = inlined_call_operand.hbm [shape: f32[1,4], index: 2, kind: output, shape index: {}]  }
   0x1   :  { %8 = vsyncpa [#allocation6], 0 }
   0x2   :  { %9 = vsyncpa [#allocation4], 0  ;;  %s14_s11 = sshll.u32 %s1241_s0, 4  ;;  %s1099_s12 = smov [#allocation2]   ;;  %s15_s11 = int_to_ptr.hbm [resolvable:$true] %s14_s11 }
   0x3   :  { %s16_s13 = sshll.u32 %s1099_s12, 4  ;;  %s27_s16 = sshll.u32 %s1242_s1, 4  ;;  %s17_s13 = int_to_ptr.vmem [resolvable:$true] %s16_s13  ;;  %s28_s16 = int_to_ptr.hbm [resolvable:$true] %s27_s16 }
   0x4   :  { %s1100_s17 = smov 128   ;;  %s1101_s18 = smov 8  }
   0x5   :  { %22 = dma.hbm_to_vmem [thread:$0]  %s15_s11, 256, %s17_s13, [#allocation3], %s1100_s17, %s1100_s17, %s1101_s18  }
   0x6   :  { %s1102_s19 = smov [#allocation5]  }
   0x7   :  { %s29_s20 = sshll.u32 %s1102_s19, 4  ;;  %s30_s20 = int_to_ptr.vmem [resolvable:$true] %s29_s20 }
   0x8   :  { %35 = dma.hbm_to_vmem [thread:$0]  %s28_s16, 2048, %s30_s20, [#allocation6], %s1100_s17, %s1100_s17, %s1101_s18  }
   0x9   :  { %1093 = dma.done.wait [#allocation3], 256  }
   0xa   :  { %1094 = vsyncadd [#allocation3], 4294967040 }
   0xb   :  { %1095 = dma.done.wait [#allocation6], 2048  }
   0xc   :  { %1096 = vsyncadd [#allocation6], 4294965248  ;;  %v868_v0 = vld [vmem:[#allocation5 + $0x20] sm:$0xf]  ;;  %v923_v1 = vld [vmem:[#allocation5 + $0x24] sm:$0xf0] }
   0xd   :  { %v1129_v2 = vld [vmem:[#allocation5] sm:$0xff]  ;;  %v1131_v3 = vor.u32 %v923_v1, %v868_v0  ;;  %v864_v5 = vld [vmem:[#allocation5 + $0x10] sm:$0xf]  ;;  %v922_v6 = vld [vmem:[#allocation5 + $0x14] sm:$0xf0]  ;;  %vm78_vm0 = vcmask 1043456  }
   0xe   :  { %v70_v4 = vunpack.c.l.b16 %v1129_v2  ;;  %v65_v7 = vld [vmem:[#allocation2 + $0x8] sm:$0xff]  ;;  %v1135_v9 = vor.u32 %v922_v6, %v864_v5  ;;  %vm74_vm1 = vcmask 64512   ;;  %v1103_v12 = vmov 0   ;;  %v1153_v13 = vld [vmem:[#allocation5 + $0x8] sm:$0x11]  ;;  %s1104_s0 = smov 64  }
   0xf   :  { %133 = vmatpush.bf16.msra.mxu2 %v1131_v3  ;;  %191 = vmatpush.bf16.msra.mxu3 %v1131_v3  ;;  %v1139_v11 = vpack.c.bf16 %v65_v7, %v65_v7  ;;  %v60_v14 = vunpack.c.l.bf16 %v1153_v13  ;;  %s1105_s1 = smov 32   ;;  %vm123_vm6 = vcmask 261120   ;;  %s1106_s21 = smov 96  }
  0x10   :  { %v72_v8 = vpack.c.b16 %v70_v4, %v70_v4  ;;  %s1107_s22 = smov [#allocation7]   ;;  %s849_s26 = sshll.u32 %s1243_s2, 4  ;;  %s850_s26 = int_to_ptr.hbm [resolvable:$true] %s849_s26 }
  0x11   :  { %v67_v15 = vperm.slane %v60_v14, 0  ;;  %s847_s23 = sshll.u32 %s1107_s22, 4  ;;  %s848_s23 = int_to_ptr.vmem [resolvable:$true] %s847_s23 }
  0x12   :  { %v80_v10 = vsel %vm78_vm0, %v72_v8, 0 }
  0x13   :  { %92 = vmatpush.bf16.msra.mxu0 %v80_v10  ;;  %134 = vmatpush.bf16.msra.mxu2 %v1135_v9 }
  0x14   :  { %192 = vmatpush.bf16.msra.mxu3 %v1135_v9 }
  0x16   :  { %860 = vmatmul.msk.bf16.vlgmr.msra.gmra.mxu0 %vm74_vm1, %v1139_v11  ;;  %135 = vmatmul.bf16.vlgmr.msra.gmra.mxu2 %v1103_v12 }
  0x17   :  { %257 = vmatpush.bf16.msrb.mxu0 %v1131_v3  ;;  %389 = vmatpush.bf16.msrb.mxu2 %v1131_v3 }
  0x18   :  { %454 = vmatpush.bf16.msrb.mxu3 %v1131_v3 }
  0x1b   :  { %258 = vmatpush.bf16.msrb.mxu0 %v1135_v9  ;;  %390 = vmatpush.bf16.msrb.mxu2 %v1135_v9 }
  0x1c   :  { %455 = vmatpush.bf16.msrb.mxu3 %v1135_v9 }
  0x1f   :  { %521 = vmatpush.bf16.msra.mxu0 %v1131_v3 }
  0x23   :  { %522 = vmatpush.bf16.msra.mxu0 %v1135_v9 }
  0x93   :  { %v94_v16 = vpop.f32.mrf.mxu0 }
  0x94   :  { %v1158_v17 = vadd.f32 %v94_v16, %v67_v15 }
  0x99   :  { %v136_v18 = vpop.f32.mrf.mxu2 }
  0x9a   :  { %v140_v19 = vadd.f32 %v136_v18, %v1158_v17 }
  0x9b   :  { %v96_v20 = vpop.f32.mrf.mxu0 }
  0x9c   :  { %941 = vtanh.f32 %v140_v19  ;;  %v870_v23 = vmul.f32 -1.442695, %v140_v19 }
  0x9e   :  { %943 = vpow2.f32 %v870_v23 }
  0xa1   :  { %v138_v21 = vpop.f32.mrf.mxu2 }
  0xa2   :  { %v942_v22 = vpop.eup %941 }
  0xa3   :  { %163 = vrot.lane.b32.xlu0 %v942_v22, %s1104_s0 }
  0xa4   :  { %v944_v24 = vpop.eup %943 }
  0xa5   :  { %v144_v25 = vadd.f32 1.0, %v944_v24 }
  0xa7   :  { %945 = vrcp.f32 %v144_v25  ;;  %v156_v31 = vand.u32 2147483648, %v144_v25  ;;  %vm150_vm3 = vweird.f32 %v144_v25  ;;  %v154_v32 = vand.u32 2147483647, %v144_v25 }
  0xa9   :  { %v157_v34 = vor.u32 1.1754944e-38, %v156_v31  ;;  %vm155_vm5 = vcmp.eq.f32.partialorder %v154_v32, 8.507059e+37 }
  0xad   :  { %v946_v26 = vpop.eup %945 }
  0xae   :  { %v146_v27 = vmul.f32 %v946_v26, %v144_v25  ;;  %vm151_vm2 = vweird.f32 %v946_v26 }
  0xaf   :  { %vm152_vm4 = vmor %vm150_vm3, %vm151_vm2 }
  0xb0   :  { %v147_v28 = vsub.f32 1.0, %v146_v27 }
  0xb2   :  { %v148_v29 = vmul.f32 %v946_v26, %v147_v28 }
  0xb4   :  { %v149_v30 = vadd.f32 %v946_v26, %v148_v29 }
  0xb6   :  { %v153_v33 = vsel %vm152_vm4, %v946_v26, %v149_v30 }
  0xb7   :  { %v158_v36 = vsel %vm155_vm5, %v157_v34, %v153_v33 }
  0xb8   :  { %v161_v38 = vmul.f32 0.0, %v158_v36 }
 0x115   :  { %v164_v35 = vpop.permute.xlu0 %163 }
 0x116   :  { %v166_v37 = vmul.f32 %v164_v35, %v158_v36 }
 0x118   :  { %168 = vrot.lane.b32.xlu0 %v166_v37, %s1105_s1 }
 0x18a   :  { %v169_v39 = vpop.permute.xlu0 %168 }
 0x18b   :  { %v171_v40 = vadd.f32 %v169_v39, %v161_v38 }
 0x18d   :  { %947 = vtanh.f32 %v171_v40  ;;  %v223_v4 = vrot.slane %v171_v40, 7 }
 0x193   :  { %v948_v41 = vpop.eup %947 }
 0x194   :  { %174 = vrot.lane.b32.xlu1 %v948_v41, %s1104_s0 }
 0x206   :  { %v175_v42 = vpop.permute.xlu1 %174 }
 0x207   :  { %v177_v43 = vmul.f32 %v175_v42, %v158_v36 }
 0x209   :  { %v178_v44 = vpack.c.bf16 %v177_v43, %v177_v43 }
 0x20b   :  { %180 = vrot.lane.b32.xlu1 %v178_v44, %s1105_s1  ;;  %v71_v44 = vunpack.c.h.b16 %v1129_v2 }
 0x27d   :  { %v181_v45 = vpop.permute.xlu1 %180 }
 0x27e   :  { %871 = vmatmul.msk.bf16.vlgmr.msra.gmra.mxu3 %vm123_vm6, %v181_v45  ;;  %v73_v45 = vpack.c.b16 %v71_v44, %v71_v44 }
 0x301   :  { %v194_v46 = vpop.f32.mrf.mxu3 }
 0x302   :  { %v199_v47 = vrot.slane %v194_v46, 7  ;;  %v83_v46 = vsel %vm78_vm0, %v73_v45, 0 }
 0x303   :  { %105 = vmatpush.bf16.msra.mxu1 %v83_v46 }
 0x304   :  { %v201_v48 = vadd.f32 %v199_v47, %v1158_v17 }
 0x306   :  { %949 = vtanh.f32 %v201_v48  ;;  %v872_v51 = vmul.f32 -1.442695, %v201_v48  ;;  %861 = vmatmul.msk.bf16.vlgmr.msra.gmra.mxu1 %vm74_vm1, %v1139_v11 }
 0x307   :  { %322 = vmatpush.bf16.msrb.mxu1 %v1131_v3 }
 0x308   :  { %951 = vpow2.f32 %v872_v51 }
 0x309   :  { %v196_v49 = vpop.f32.mrf.mxu3 }
 0x30b   :  { %323 = vmatpush.bf16.msrb.mxu1 %v1135_v9 }
 0x30c   :  { %v950_v50 = vpop.eup %949 }
 0x30d   :  { %227 = vrot.lane.b32.xlu2 %v950_v50, %s1104_s0 }
 0x30e   :  { %v952_v52 = vpop.eup %951 }
 0x30f   :  { %v205_v53 = vadd.f32 1.0, %v952_v52  ;;  %586 = vmatpush.bf16.msra.mxu1 %v1131_v3 }
 0x311   :  { %953 = vrcp.f32 %v205_v53  ;;  %v217_v59 = vand.u32 2147483648, %v205_v53  ;;  %vm211_vm8 = vweird.f32 %v205_v53  ;;  %v215_v60 = vand.u32 2147483647, %v205_v53 }
 0x313   :  { %v218_v62 = vor.u32 1.1754944e-38, %v217_v59  ;;  %vm216_vm10 = vcmp.eq.f32.partialorder %v215_v60, 8.507059e+37  ;;  %587 = vmatpush.bf16.msra.mxu1 %v1135_v9 }
 0x317   :  { %v954_v54 = vpop.eup %953 }
 0x318   :  { %v207_v55 = vmul.f32 %v954_v54, %v205_v53  ;;  %vm212_vm7 = vweird.f32 %v954_v54 }
 0x319   :  { %vm213_vm9 = vmor %vm211_vm8, %vm212_vm7 }
 0x31a   :  { %v208_v56 = vsub.f32 1.0, %v207_v55 }
 0x31c   :  { %v209_v57 = vmul.f32 %v954_v54, %v208_v56 }
 0x31e   :  { %v210_v58 = vadd.f32 %v954_v54, %v209_v57 }
 0x320   :  { %v214_v61 = vsel %vm213_vm9, %v954_v54, %v210_v58 }
 0x321   :  { %v219_v0 = vsel %vm216_vm10, %v218_v62, %v214_v61 }
 0x322   :  { %v225_v5 = vmul.f32 %v223_v4, %v219_v0 }
 0x367   :  { %v228_v63 = vpop.permute.xlu2 %227 }
 0x368   :  { %v230_v1 = vmul.f32 %v228_v63, %v219_v0 }
 0x36a   :  { %232 = vrot.lane.b32.xlu2 %v230_v1, %s1105_s1 }
 0x383   :  { %v1186_v51 = vpop.f32.mrf.mxu1 }
 0x38b   :  { %v109_v52 = vpop.f32.mrf.mxu1 }
 0x3c4   :  { %v233_v6 = vpop.permute.xlu2 %232 }
 0x3c5   :  { %v235_v7 = vadd.f32 %v233_v6, %v225_v5 }
 0x3c7   :  { %955 = vtanh.f32 %v235_v7  ;;  %v289_v39 = vrot.slane %v235_v7, 7 }
 0x3cd   :  { %v956_v8 = vpop.eup %955 }
 0x3ce   :  { %238 = vrot.lane.b32.xlu0 %v956_v8, %s1104_s0 }
 0x440   :  { %v239_v10 = vpop.permute.xlu0 %238 }
 0x441   :  { %v241_v12 = vmul.f32 %v239_v10, %v219_v0 }
 0x443   :  { %v242_v15 = vpack.c.bf16 %v241_v12, %v241_v12 }
 0x445   :  { %v244_v16 = vshrl.u32 %v242_v15, 16 }
 0x447   :  { %246 = vrot.lane.b32.xlu1 %v244_v16, %s1105_s1 }
 0x4b9   :  { %v247_v18 = vpop.permute.xlu1 %246 }
 0x4ba   :  { %873 = vmatmul.msk.bf16.vlgmr.msrb.gmra.mxu0 %vm123_vm6, %v247_v18 }
 0x537   :  { %v260_v19 = vpop.f32.mrf.mxu0 }
 0x538   :  { %v265_v20 = vrot.slane %v260_v19, 6 }
 0x53a   :  { %v267_v21 = vadd.f32 %v265_v20, %v1158_v17 }
 0x53c   :  { %957 = vtanh.f32 %v267_v21  ;;  %v874_v24 = vmul.f32 -1.442695, %v267_v21 }
 0x53e   :  { %959 = vpow2.f32 %v874_v24 }
 0x53f   :  { %v262_v22 = vpop.f32.mrf.mxu0 }
 0x542   :  { %v958_v23 = vpop.eup %957 }
 0x543   :  { %293 = vrot.lane.b32.xlu2 %v958_v23, %s1104_s0 }
 0x544   :  { %v960_v25 = vpop.eup %959 }
 0x545   :  { %v271_v26 = vadd.f32 1.0, %v960_v25 }
 0x547   :  { %961 = vrcp.f32 %v271_v26  ;;  %v283_v32 = vand.u32 2147483648, %v271_v26  ;;  %vm277_vm12 = vweird.f32 %v271_v26  ;;  %v281_v33 = vand.u32 2147483647, %v271_v26 }
 0x549   :  { %v284_v35 = vor.u32 1.1754944e-38, %v283_v32  ;;  %vm282_vm14 = vcmp.eq.f32.partialorder %v281_v33, 8.507059e+37 }
 0x54d   :  { %v962_v27 = vpop.eup %961 }
 0x54e   :  { %v273_v28 = vmul.f32 %v962_v27, %v271_v26  ;;  %vm278_vm11 = vweird.f32 %v962_v27 }
 0x54f   :  { %vm279_vm13 = vmor %vm277_vm12, %vm278_vm11 }
 0x550   :  { %v274_v29 = vsub.f32 1.0, %v273_v28 }
 0x552   :  { %v275_v30 = vmul.f32 %v962_v27, %v274_v29 }
 0x554   :  { %v276_v31 = vadd.f32 %v962_v27, %v275_v30 }
 0x556   :  { %v280_v34 = vsel %vm279_vm13, %v962_v27, %v276_v31 }
 0x557   :  { %v285_v37 = vsel %vm282_vm14, %v284_v35, %v280_v34 }
 0x558   :  { %v291_v40 = vmul.f32 %v289_v39, %v285_v37 }
 0x59d   :  { %v294_v36 = vpop.permute.xlu2 %293 }
 0x59e   :  { %v296_v38 = vmul.f32 %v294_v36, %v285_v37 }
 0x5a0   :  { %298 = vrot.lane.b32.xlu0 %v296_v38, %s1105_s1 }
 0x612   :  { %v299_v41 = vpop.permute.xlu0 %298 }
 0x613   :  { %v301_v42 = vadd.f32 %v299_v41, %v291_v40 }
 0x615   :  { %963 = vtanh.f32 %v301_v42  ;;  %v354_v8 = vrot.slane %v301_v42, 7 }
 0x61b   :  { %v964_v43 = vpop.eup %963 }
 0x61c   :  { %304 = vrot.lane.b32.xlu1 %v964_v43, %s1104_s0 }
 0x68e   :  { %v305_v47 = vpop.permute.xlu1 %304 }
 0x68f   :  { %v307_v48 = vmul.f32 %v305_v47, %v285_v37 }
 0x691   :  { %v308_v49 = vpack.c.bf16 %v307_v48, %v307_v48 }
 0x693   :  { %v310_v50 = vrot.slane %v308_v49, 1 }
 0x695   :  { %311 = vrot.lane.b32.xlu2 %v310_v50, %s1105_s1 }
 0x6ef   :  { %v312_v2 = vpop.permute.xlu2 %311 }
 0x6f0   :  { %875 = vmatmul.msk.bf16.vlgmr.msrb.gmra.mxu1 %vm123_vm6, %v312_v2 }
 0x76d   :  { %v325_v53 = vpop.f32.mrf.mxu1 }
 0x76e   :  { %v330_v11 = vrot.slane %v325_v53, 5 }
 0x770   :  { %v332_v54 = vadd.f32 %v330_v11, %v1158_v17 }
 0x772   :  { %965 = vtanh.f32 %v332_v54  ;;  %v876_v9 = vmul.f32 -1.442695, %v332_v54 }
 0x774   :  { %967 = vpow2.f32 %v876_v9 }
 0x775   :  { %v327_v3 = vpop.f32.mrf.mxu1 }
 0x778   :  { %v966_v55 = vpop.eup %965 }
 0x779   :  { %358 = vrot.lane.b32.xlu0 %v966_v55, %s1104_s0 }
 0x77a   :  { %v968_v56 = vpop.eup %967 }
 0x77b   :  { %v336_v57 = vadd.f32 1.0, %v968_v56 }
 0x77d   :  { %969 = vrcp.f32 %v336_v57  ;;  %v348_v63 = vand.u32 2147483648, %v336_v57  ;;  %vm342_vm0 = vweird.f32 %v336_v57  ;;  %v346_v0 = vand.u32 2147483647, %v336_v57 }
 0x77f   :  { %v349_v4 = vor.u32 1.1754944e-38, %v348_v63  ;;  %vm347_vm2 = vcmp.eq.f32.partialorder %v346_v0, 8.507059e+37 }
 0x783   :  { %v970_v58 = vpop.eup %969 }
 0x784   :  { %v338_v59 = vmul.f32 %v970_v58, %v336_v57  ;;  %vm343_vm15 = vweird.f32 %v970_v58 }
 0x785   :  { %vm344_vm1 = vmor %vm342_vm0, %vm343_vm15 }
 0x786   :  { %v339_v60 = vsub.f32 1.0, %v338_v59 }
 0x788   :  { %v340_v61 = vmul.f32 %v970_v58, %v339_v60 }
 0x78a   :  { %v341_v62 = vadd.f32 %v970_v58, %v340_v61 }
 0x78c   :  { %v345_v1 = vsel %vm344_vm1, %v970_v58, %v341_v62 }
 0x78d   :  { %v350_v6 = vsel %vm347_vm2, %v349_v4, %v345_v1 }
 0x78e   :  { %v356_v10 = vmul.f32 %v354_v8, %v350_v6 }
 0x7eb   :  { %v359_v5 = vpop.permute.xlu0 %358 }
 0x7ec   :  { %v361_v7 = vmul.f32 %v359_v5, %v350_v6 }
 0x7ee   :  { %363 = vrot.lane.b32.xlu1 %v361_v7, %s1105_s1 }
 0x860   :  { %v364_v12 = vpop.permute.xlu1 %363 }
 0x861   :  { %v366_v15 = vadd.f32 %v364_v12, %v356_v10 }
 0x863   :  { %971 = vtanh.f32 %v366_v15  ;;  %v421_v44 = vrot.slane %v366_v15, 7 }
 0x869   :  { %v972_v16 = vpop.eup %971 }
 0x86a   :  { %369 = vrot.lane.b32.xlu2 %v972_v16, %s1104_s0 }
 0x8c4   :  { %v370_v18 = vpop.permute.xlu2 %369 }
 0x8c5   :  { %v372_v19 = vmul.f32 %v370_v18, %v350_v6 }
 0x8c7   :  { %v373_v20 = vpack.c.bf16 %v372_v19, %v372_v19 }
 0x8c9   :  { %v375_v21 = vshrl.u32 %v373_v20, 16 }
 0x8cb   :  { %v377_v22 = vrot.slane %v375_v21, 1 }
 0x8cd   :  { %378 = vrot.lane.b32.xlu0 %v377_v22, %s1105_s1 }
 0x93f   :  { %v379_v23 = vpop.permute.xlu0 %378 }
 0x940   :  { %877 = vmatmul.msk.bf16.vlgmr.msrb.gmra.mxu2 %vm123_vm6, %v379_v23 }
 0x9c3   :  { %v392_v24 = vpop.f32.mrf.mxu2 }
 0x9c4   :  { %v397_v25 = vrot.slane %v392_v24, 4 }
 0x9c6   :  { %v399_v26 = vadd.f32 %v397_v25, %v1158_v17 }
 0x9c8   :  { %973 = vtanh.f32 %v399_v26  ;;  %v878_v29 = vmul.f32 -1.442695, %v399_v26 }
 0x9ca   :  { %975 = vpow2.f32 %v878_v29 }
 0x9cb   :  { %v394_v27 = vpop.f32.mrf.mxu2 }
 0x9ce   :  { %v974_v28 = vpop.eup %973 }
 0x9cf   :  { %425 = vrot.lane.b32.xlu1 %v974_v28, %s1104_s0 }
 0x9d0   :  { %v976_v30 = vpop.eup %975 }
 0x9d1   :  { %v403_v31 = vadd.f32 1.0, %v976_v30 }
 0x9d3   :  { %977 = vrcp.f32 %v403_v31  ;;  %v415_v37 = vand.u32 2147483648, %v403_v31  ;;  %vm409_vm4 = vweird.f32 %v403_v31  ;;  %v413_v38 = vand.u32 2147483647, %v403_v31 }
 0x9d5   :  { %v416_v40 = vor.u32 1.1754944e-38, %v415_v37  ;;  %vm414_vm7 = vcmp.eq.f32.partialorder %v413_v38, 8.507059e+37 }
 0x9d9   :  { %v978_v32 = vpop.eup %977 }
 0x9da   :  { %v405_v33 = vmul.f32 %v978_v32, %v403_v31  ;;  %vm410_vm3 = vweird.f32 %v978_v32 }
 0x9db   :  { %vm411_vm5 = vmor %vm409_vm4, %vm410_vm3 }
 0x9dc   :  { %v406_v34 = vsub.f32 1.0, %v405_v33 }
 0x9de   :  { %v407_v35 = vmul.f32 %v978_v32, %v406_v34 }
 0x9e0   :  { %v408_v36 = vadd.f32 %v978_v32, %v407_v35 }
 0x9e2   :  { %v412_v39 = vsel %vm411_vm5, %v978_v32, %v408_v36 }
 0x9e3   :  { %v417_v42 = vsel %vm414_vm7, %v416_v40, %v412_v39 }
 0x9e4   :  { %v423_v45 = vmul.f32 %v421_v44, %v417_v42 }
 0xa41   :  { %v426_v41 = vpop.permute.xlu1 %425 }
 0xa42   :  { %v428_v43 = vmul.f32 %v426_v41, %v417_v42 }
 0xa44   :  { %430 = vrot.lane.b32.xlu2 %v428_v43, %s1105_s1 }
 0xa9e   :  { %v431_v46 = vpop.permute.xlu2 %430 }
 0xa9f   :  { %v433_v47 = vadd.f32 %v431_v46, %v423_v45 }
 0xaa1   :  { %979 = vtanh.f32 %v433_v47  ;;  %v486_v10 = vrot.slane %v433_v47, 7 }
 0xaa7   :  { %v980_v48 = vpop.eup %979 }
 0xaa8   :  { %436 = vrot.lane.b32.xlu0 %v980_v48, %s1104_s0  ;;  %v61_v48 = vunpack.c.h.bf16 %v1153_v13 }
 0xb1a   :  { %v437_v49 = vpop.permute.xlu0 %436 }
 0xb1b   :  { %v439_v50 = vmul.f32 %v437_v49, %v417_v42 }
 0xb1d   :  { %v440_v2 = vpack.c.bf16 %v439_v50, %v439_v50  ;;  %v68_v50 = vperm.slane %v61_v48, 0 }
 0xb1f   :  { %v442_v52 = vrot.slane %v440_v2, 2 }
 0xb21   :  { %443 = vrot.lane.b32.xlu1 %v442_v52, %s1105_s1  ;;  %v108_v52 = vadd.f32 %v1186_v51, %v68_v50  ;;  %v890_v50 = vld [vmem:[#allocation5 + $0x58] sm:$0xf0] }
 0xb93   :  { %v444_v53 = vpop.permute.xlu1 %443 }
 0xb94   :  { %879 = vmatmul.msk.bf16.vlgmr.msrb.gmra.mxu3 %vm123_vm6, %v444_v53 }
 0xc17   :  { %v457_v11 = vpop.f32.mrf.mxu3 }
 0xc18   :  { %v462_v54 = vrot.slane %v457_v11, 3 }
 0xc1a   :  { %v464_v3 = vadd.f32 %v462_v54, %v1158_v17 }
 0xc1c   :  { %981 = vtanh.f32 %v464_v3  ;;  %v880_v56 = vmul.f32 -1.442695, %v464_v3 }
 0xc1e   :  { %983 = vpow2.f32 %v880_v56  ;;  %v885_v56 = vmul.f32 -1.442695, %v108_v52 }
 0xc1f   :  { %v459_v55 = vpop.f32.mrf.mxu3 }
 0xc22   :  { %v982_v9 = vpop.eup %981 }
 0xc23   :  { %490 = vrot.lane.b32.xlu2 %v982_v9, %s1104_s0 }
 0xc24   :  { %v984_v57 = vpop.eup %983 }
 0xc25   :  { %v468_v58 = vadd.f32 1.0, %v984_v57 }
 0xc27   :  { %985 = vrcp.f32 %v468_v58  ;;  %v480_v0 = vand.u32 2147483648, %v468_v58  ;;  %vm474_vm9 = vweird.f32 %v468_v58  ;;  %v478_v1 = vand.u32 2147483647, %v468_v58 }
 0xc29   :  { %v481_v5 = vor.u32 1.1754944e-38, %v480_v0  ;;  %vm479_vm11 = vcmp.eq.f32.partialorder %v478_v1, 8.507059e+37 }
 0xc2d   :  { %v986_v59 = vpop.eup %985 }
 0xc2e   :  { %v470_v60 = vmul.f32 %v986_v59, %v468_v58  ;;  %vm475_vm8 = vweird.f32 %v986_v59 }
 0xc2f   :  { %vm476_vm10 = vmor %vm474_vm9, %vm475_vm8 }
 0xc30   :  { %v471_v61 = vsub.f32 1.0, %v470_v60 }
 0xc32   :  { %v472_v62 = vmul.f32 %v986_v59, %v471_v61 }
 0xc34   :  { %v473_v63 = vadd.f32 %v986_v59, %v472_v62 }
 0xc36   :  { %v477_v4 = vsel %vm476_vm10, %v986_v59, %v473_v63 }
 0xc37   :  { %v482_v7 = vsel %vm479_vm11, %v481_v5, %v477_v4 }
 0xc38   :  { %v488_v12 = vmul.f32 %v486_v10, %v482_v7 }
 0xc7d   :  { %v491_v6 = vpop.permute.xlu2 %490 }
 0xc7e   :  { %v493_v8 = vmul.f32 %v491_v6, %v482_v7 }
 0xc80   :  { %495 = vrot.lane.b32.xlu0 %v493_v8, %s1105_s1 }
 0xcf2   :  { %v496_v15 = vpop.permute.xlu0 %495 }
 0xcf3   :  { %v498_v16 = vadd.f32 %v496_v15, %v488_v12 }
 0xcf5   :  { %987 = vtanh.f32 %v498_v16  ;;  %v553_v45 = vrot.slane %v498_v16, 7 }
 0xcfb   :  { %v988_v18 = vpop.eup %987 }
 0xcfc   :  { %501 = vrot.lane.b32.xlu1 %v988_v18, %s1104_s0 }
 0xd6e   :  { %v502_v19 = vpop.permute.xlu1 %501 }
 0xd6f   :  { %v504_v20 = vmul.f32 %v502_v19, %v482_v7 }
 0xd71   :  { %v505_v21 = vpack.c.bf16 %v504_v20, %v504_v20 }
 0xd73   :  { %v507_v22 = vshrl.u32 %v505_v21, 16 }
 0xd75   :  { %v509_v23 = vrot.slane %v507_v22, 2 }
 0xd77   :  { %510 = vrot.lane.b32.xlu2 %v509_v23, %s1105_s1 }
 0xdd1   :  { %v511_v24 = vpop.permute.xlu2 %510 }
 0xdd2   :  { %881 = vmatmul.msk.bf16.vlgmr.msra.gmra.mxu0 %vm123_vm6, %v511_v24 }
 0xe4f   :  { %v524_v25 = vpop.f32.mrf.mxu0 }
 0xe50   :  { %v529_v26 = vrot.slane %v524_v25, 2 }
 0xe52   :  { %v531_v27 = vadd.f32 %v529_v26, %v1158_v17 }
 0xe54   :  { %989 = vtanh.f32 %v531_v27  ;;  %v882_v30 = vmul.f32 -1.442695, %v531_v27 }
 0xe56   :  { %991 = vpow2.f32 %v882_v30 }
 0xe57   :  { %v526_v28 = vpop.f32.mrf.mxu0 }
 0xe5a   :  { %v990_v29 = vpop.eup %989 }
 0xe5b   :  { %557 = vrot.lane.b32.xlu0 %v990_v29, %s1104_s0 }
 0xe5c   :  { %v992_v31 = vpop.eup %991 }
 0xe5d   :  { %v535_v32 = vadd.f32 1.0, %v992_v31 }
 0xe5f   :  { %993 = vrcp.f32 %v535_v32  ;;  %v547_v38 = vand.u32 2147483648, %v535_v32  ;;  %vm541_vm13 = vweird.f32 %v535_v32  ;;  %v545_v39 = vand.u32 2147483647, %v535_v32 }
 0xe61   :  { %v548_v41 = vor.u32 1.1754944e-38, %v547_v38  ;;  %vm546_vm15 = vcmp.eq.f32.partialorder %v545_v39, 8.507059e+37  ;;  %v896_v38 = vld [vmem:[#allocation5 + $0x60] sm:$0xf]  ;;  %v931_v39 = vld [vmem:[#allocation5 + $0x64] sm:$0xf0] }
 0xe65   :  { %v994_v33 = vpop.eup %993 }
 0xe66   :  { %v537_v34 = vmul.f32 %v994_v33, %v535_v32  ;;  %vm542_vm12 = vweird.f32 %v994_v33 }
 0xe67   :  { %vm543_vm14 = vmor %vm541_vm13, %vm542_vm12 }
 0xe68   :  { %v538_v35 = vsub.f32 1.0, %v537_v34 }
 0xe6a   :  { %v539_v36 = vmul.f32 %v994_v33, %v538_v35 }
 0xe6c   :  { %v540_v37 = vadd.f32 %v994_v33, %v539_v36 }
 0xe6e   :  { %v544_v40 = vsel %vm543_vm14, %v994_v33, %v540_v37 }
 0xe6f   :  { %v549_v43 = vsel %vm546_vm15, %v548_v41, %v544_v40  ;;  %v930_v40 = vld [vmem:[#allocation5 + $0x64] sm:$0xf]  ;;  %v897_v41 = vor.u32 %v931_v39, %v896_v38 }
 0xe70   :  { %v555_v46 = vmul.f32 %v553_v45, %v549_v43  ;;  %v929_v45 = vld [vmem:[#allocation5 + $0x54] sm:$0xf0] }
 0xe71   :  { %705 = vmatpush.bf16.msra.mxu2 %v897_v41 }
 0xecd   :  { %v558_v42 = vpop.permute.xlu0 %557 }
 0xece   :  { %v560_v44 = vmul.f32 %v558_v42, %v549_v43  ;;  %v898_v42 = vld [vmem:[#allocation5 + $0x68] sm:$0xf0] }
 0xed0   :  { %562 = vrot.lane.b32.xlu1 %v560_v44, %s1105_s1  ;;  %v888_v44 = vld [vmem:[#allocation5 + $0x50] sm:$0xf] }
 0xf42   :  { %v563_v47 = vpop.permute.xlu1 %562 }
 0xf43   :  { %v1210_v49 = vadd.f32 %v563_v47, %v555_v46  ;;  %v928_v46 = vld [vmem:[#allocation5 + $0x54] sm:$0xf]  ;;  %v889_v47 = vor.u32 %v929_v45, %v888_v44 }
 0xf45   :  { %995 = vtanh.f32 %v1210_v49  ;;  %706 = vmatpush.bf16.msra.mxu2 %v889_v47 }
 0xf46   :  { %997 = vtanh.f32 %v108_v52  ;;  %v618_v52 = vrot.slane %v1210_v49, 7  ;;  %v914_v49 = vld [vmem:[#allocation5 + $0x40] sm:$0xf] }
 0xf47   :  { %999 = vpow2.f32 %v885_v56 }
 0xf4b   :  { %v996_v2 = vpop.eup %995 }
 0xf4c   :  { %568 = vrot.lane.b32.xlu2 %v996_v2, %s1104_s0  ;;  %v998_v53 = vpop.eup %997  ;;  %v893_v2 = vor.u32 %v928_v46, %v890_v50 }
 0xf4d   :  { %v1000_v57 = vpop.eup %999 }
 0xf4e   :  { %v640_v58 = vadd.f32 1.0, %v1000_v57 }
 0xf50   :  { %1001 = vrcp.f32 %v640_v58  ;;  %vm646_vm0 = vweird.f32 %v640_v58  ;;  %v652_v62 = vand.u32 2147483648, %v640_v58  ;;  %v650_v1 = vand.u32 2147483647, %v640_v58 }
 0xf52   :  { %v653_v6 = vor.u32 1.1754944e-38, %v652_v62  ;;  %vm651_vm3 = vcmp.eq.f32.partialorder %v650_v1, 8.507059e+37  ;;  %v916_v62 = vld [vmem:[#allocation5 + $0x48] sm:$0xf0] }
 0xf54   :  { %658 = vrot.lane.b32.xlu2 %v998_v53, %s1104_s0 }
 0xf56   :  { %v1002_v51 = vpop.eup %1001 }
 0xf57   :  { %v642_v59 = vmul.f32 %v1002_v51, %v640_v58  ;;  %vm647_vm1 = vweird.f32 %v1002_v51 }
 0xf58   :  { %vm648_vm2 = vmor %vm646_vm0, %vm647_vm1 }
 0xf59   :  { %v643_v60 = vsub.f32 1.0, %v642_v59  ;;  %v927_v59 = vld [vmem:[#allocation5 + $0x44] sm:$0xf0] }
 0xf5b   :  { %v644_v61 = vmul.f32 %v1002_v51, %v643_v60  ;;  %v926_v60 = vld [vmem:[#allocation5 + $0x44] sm:$0xf] }
 0xf5c   :  { %v919_v1 = vor.u32 %v926_v60, %v916_v62 }
 0xf5d   :  { %v645_v0 = vadd.f32 %v1002_v51, %v644_v61  ;;  %v915_v61 = vor.u32 %v927_v59, %v914_v49 }
 0xf5e   :  { %773 = vmatpush.bf16.msrb.mxu1 %v919_v1 }
 0xf5f   :  { %v649_v7 = vsel %vm648_vm2, %v1002_v51, %v645_v0  ;;  %v925_v0 = vld [vmem:[#allocation5 + $0x34] sm:$0xf0]  ;;  %760 = vmatpush.bf16.msrb.mxu0 %v915_v61 }
 0xf60   :  { %v654_v10 = vsel %vm651_vm3, %v653_v6, %v649_v7 }
 0xfa6   :  { %v569_v11 = vpop.permute.xlu2 %568 }
 0xfa7   :  { %v571_v54 = vmul.f32 %v569_v11, %v549_v43  ;;  %v901_v43 = vor.u32 %v930_v40, %v898_v42 }
 0xfa9   :  { %v572_v3 = vpack.c.bf16 %v571_v54, %v571_v54  ;;  %718 = vmatpush.bf16.msra.mxu3 %v901_v43 }
 0xfab   :  { %v574_v55 = vrot.slane %v572_v3, 3 }
 0xfad   :  { %575 = vrot.lane.b32.xlu0 %v574_v55, %s1105_s1  ;;  %719 = vmatpush.bf16.msra.mxu3 %v893_v2 }
 0xfae   :  { %v659_v8 = vpop.permute.xlu2 %658 }
 0xfaf   :  { %v661_v15 = vmul.f32 %v659_v8, %v654_v10 }
0x101f   :  { %v576_v9 = vpop.permute.xlu0 %575 }
0x1020   :  { %883 = vmatmul.msk.bf16.vlgmr.msra.gmra.mxu1 %vm123_vm6, %v576_v9 }
0x109d   :  { %v589_v63 = vpop.f32.mrf.mxu1 }
0x109e   :  { %v594_v4 = vrot.slane %v589_v63, 1  ;;  %v906_v63 = vld [vmem:[#allocation5 + $0x30] sm:$0xf] }
0x109f   :  { %v907_v6 = vor.u32 %v925_v0, %v906_v63 }
0x10a0   :  { %v596_v5 = vadd.f32 %v594_v4, %v1158_v17  ;;  %v924_v4 = vld [vmem:[#allocation5 + $0x34] sm:$0xf] }
0x10a1   :  { %761 = vmatpush.bf16.msrb.mxu0 %v907_v6 }
0x10a2   :  { %1003 = vtanh.f32 %v596_v5  ;;  %v884_v19 = vmul.f32 -1.442695, %v596_v5  ;;  %v908_v5 = vld [vmem:[#allocation5 + $0x38] sm:$0xf0] }
0x10a3   :  { %1005 = vtanh.f32 %v661_v15  ;;  %v911_v7 = vor.u32 %v924_v4, %v908_v5 }
0x10a4   :  { %1007 = vpow2.f32 %v884_v19 }
0x10a5   :  { %v591_v12 = vpop.f32.mrf.mxu1  ;;  %774 = vmatpush.bf16.msrb.mxu1 %v911_v7 }
0x10a8   :  { %v1004_v16 = vpop.eup %1003 }
0x10a9   :  { %622 = vrot.lane.b32.xlu1 %v1004_v16, %s1104_s0  ;;  %v1006_v18 = vpop.eup %1005  ;;  %v58_v16 = vld [vmem:[#allocation5 + $0x70] sm:$0x33] }
0x10aa   :  { %v1008_v20 = vpop.eup %1007 }
0x10ab   :  { %v600_v21 = vadd.f32 1.0, %v1008_v20 }
0x10ad   :  { %1009 = vrcp.f32 %v600_v21  ;;  %v612_v26 = vand.u32 2147483648, %v600_v21  ;;  %vm606_vm5 = vweird.f32 %v600_v21  ;;  %v610_v27 = vand.u32 2147483647, %v600_v21 }
0x10af   :  { %v613_v29 = vor.u32 1.1754944e-38, %v612_v26  ;;  %vm611_vm8 = vcmp.eq.f32.partialorder %v610_v27, 8.507059e+37 }
0x10b1   :  { %664 = vrot.lane.b32.xlu1 %v1006_v18, %s1106_s21  ;;  %v793_v18 = vunpack.c.l.b16 %v58_v16 }
0x10b3   :  { %v1010_v17 = vpop.eup %1009  ;;  %v795_v19 = vpack.c.b16 %v793_v18, %v793_v18 }
0x10b4   :  { %v602_v22 = vmul.f32 %v1010_v17, %v600_v21  ;;  %vm607_vm4 = vweird.f32 %v1010_v17  ;;  %v794_v21 = vunpack.c.h.b16 %v58_v16 }
0x10b5   :  { %vm608_vm7 = vmor %vm606_vm5, %vm607_vm4  ;;  %809 = vmatpush.bf16.xpose.msrb.mxu2 %v795_v19 }
0x10b6   :  { %v603_v23 = vsub.f32 1.0, %v602_v22  ;;  %v782_v22 = vrot.slane %v60_v14, 1  ;;  %v62_v14 = vld [vmem:[#allocation5 + $0x8] sm:$0x2] }
0x10b8   :  { %v604_v24 = vmul.f32 %v1010_v17, %v603_v23  ;;  %v783_v23 = vrot.slane %v61_v48, 1 }
0x10ba   :  { %v605_v25 = vadd.f32 %v1010_v17, %v604_v24 }
0x10bc   :  { %v609_v28 = vsel %vm608_vm7, %v1010_v17, %v605_v25  ;;  %v796_v17 = vpack.c.b16 %v794_v21, %v794_v21 }
0x10bd   :  { %v614_v31 = vsel %vm611_vm8, %v613_v29, %v609_v28 }
0x10be   :  { %v620_v53 = vmul.f32 %v618_v52, %v614_v31  ;;  %822 = vmatpush.bf16.xpose.msrb.mxu3 %v796_v17 }
0x111b   :  { %v623_v30 = vpop.permute.xlu1 %622 }
0x111c   :  { %v625_v32 = vmul.f32 %v623_v30, %v614_v31 }
0x111e   :  { %627 = vrot.lane.b32.xlu0 %v625_v32, %s1105_s1 }
0x1123   :  { %v665_v33 = vpop.permute.xlu1 %664 }
0x1124   :  { %v667_v34 = vmul.f32 %v665_v33, %v654_v10 }
0x1126   :  { %v669_v35 = vpack.c.bf16 %v667_v34, %v667_v34 }
0x1128   :  { %v671_v36 = vshrl.u32 %v669_v35, 16 }
0x112a   :  { %v673_v37 = vrot.slane %v671_v36, 3  ;;  %v63_v36 = vunpack.c.l.bf16 %v62_v14 }
0x112c   :  { %674 = vrot.lane.b32.xlu0 %v673_v37, %s1105_s1  ;;  %v800_v13 = vrot.slane %v63_v36, 2 }
0x1190   :  { %v628_v11 = vpop.permute.xlu0 %627 }
0x1191   :  { %v630_v54 = vadd.f32 %v628_v11, %v620_v53 }
0x1193   :  { %1011 = vtanh.f32 %v630_v54 }
0x1199   :  { %v1012_v3 = vpop.eup %1011 }
0x119a   :  { %633 = vrot.lane.b32.xlu2 %v1012_v3, %s1104_s0 }
0x119e   :  { %v675_v55 = vpop.permute.xlu0 %674 }
0x119f   :  { %902 = vmatmul.msk.bf16.vlgmr.msra.gmra.mxu2 %vm123_vm6, %v675_v55  ;;  %903 = vmatmul.msk.bf16.vlgmr.msra.gmra.mxu3 %vm123_vm6, %v675_v55 }
0x11f4   :  { %v634_v9 = vpop.permute.xlu2 %633 }
0x11f5   :  { %v636_v56 = vmul.f32 %v634_v9, %v614_v31 }
0x11f7   :  { %v668_v57 = vpack.c.bf16 %v636_v56, %v636_v56 }
0x11f9   :  { %v726_v58 = vshrl.u32 %v668_v57, 16 }
0x11fb   :  { %v728_v51 = vrot.slane %v726_v58, 3 }
0x11fd   :  { %729 = vrot.lane.b32.xlu1 %v728_v51, %s1105_s1 }
0x1222   :  { %v708_v8 = vpop.f32.mrf.mxu2  ;;  %v721_v10 = vpop.f32.mrf.mxu3 }
0x122a   :  { %v710_v12 = vpop.f32.mrf.mxu2  ;;  %v723_v15 = vpop.f32.mrf.mxu3 }
0x126f   :  { %v730_v20 = vpop.permute.xlu1 %729 }
0x1270   :  { %920 = vmatmul.msk.bf16.vlgmr.msrb.gmra.mxu0 %vm123_vm6, %v730_v20  ;;  %921 = vmatmul.msk.bf16.vlgmr.msrb.gmra.mxu1 %vm123_vm6, %v730_v20  ;;  %vm828_vm6 = vcmask 24576  }
0x12ed   :  { %v763_v24 = vpop.f32.mrf.mxu0  ;;  %v776_v25 = vpop.f32.mrf.mxu1 }
0x12ee   :  { %v764_v26 = vadd.f32 %v763_v24, %v708_v8  ;;  %v777_v27 = vadd.f32 %v776_v25, %v721_v10 }
0x12f0   :  { %v786_v28 = vadd.f32 %v782_v22, %v764_v26  ;;  %v787_v29 = vadd.f32 %v783_v23, %v777_v27 }
0x12f2   :  { %1013 = vtanh.f32 %v786_v28 }
0x12f3   :  { %1015 = vtanh.f32 %v787_v29 }
0x12f5   :  { %v765_v30 = vpop.f32.mrf.mxu0  ;;  %v778_v31 = vpop.f32.mrf.mxu1 }
0x12f8   :  { %v1014_v32 = vpop.eup %1013 }
0x12f9   :  { %v1016_v33 = vpop.eup %1015  ;;  %v790_v34 = vpack.c.bf16 %v1014_v32, %v1014_v32 }
0x12fa   :  { %v791_v35 = vpack.c.bf16 %v1016_v33, %v1016_v33 }
0x12fb   :  { %810 = vmatmul.bf16.vlgmr.msrb.gmra.mxu2 %v790_v34 }
0x12fc   :  { %823 = vmatmul.bf16.vlgmr.msrb.gmra.mxu3 %v791_v35 }
0x137e   :  { %v811_v48 = vpop.f32.mrf.mxu2 }
0x137f   :  { %v812_v37 = vadd.f32 %v811_v48, %v800_v13  ;;  %v824_v38 = vpop.f32.mrf.mxu3 }
0x1381   :  { %v825_v39 = vadd.f32 %v824_v38, %v812_v37 }
0x1383   :  { %v829_v40 = vsel %vm828_vm6, %v825_v39, -inf }
0x1384   :  { %830 = vmax.xlane.f32.xlu2 %v829_v40 }
0x1386   :  { %v813_v41 = vpop.f32.mrf.mxu2 }
0x1387   :  { %v826_v42 = vpop.f32.mrf.mxu3 }
0x13f7   :  { %v831_v43 = vpop.xlane.xlu2 %830 }
0x13f8   :  { %v832_v44 = vsub.f32 %v825_v39, %v831_v43 }
0x13fa   :  { %v833_v45 = vmul.f32 1.442695, %v832_v44 }
0x13fc   :  { %1017 = vpow2.f32 %v833_v45 }
0x1402   :  { %v1018_v46 = vpop.eup %1017 }
0x1403   :  { %v835_v47 = vsel %vm828_vm6, %v1018_v46, 0.0 }
0x1404   :  { %836 = vadd.xlane.f32.xlu0 %v835_v47 }
0x1477   :  { %v837_v50 = vpop.xlane.xlu0 %836 }
0x1478   :  { %1019 = vlog2.f32 %v837_v50 }
0x147e   :  { %v1020_v2 = vpop.eup %1019 }
0x147f   :  { %v839_v52 = vmul.f32 0.6931472, %v1020_v2 }
0x1481   :  { %v840_v53 = vsub.f32 %v832_v44, %v839_v52 }
0x1483   :  { %841 = vst.msk [vmem:[#allocation7] sm:$0x1] %vm828_vm6, %v840_v53 }
0x1484   :  { %852 = dma.vmem_to_hbm [thread:$0]  %s848_s23, 16, %s850_s26, [#allocation4]  }
0x1485   :  { %1097 = dma.done.wait [#allocation4], 16  }
0x1486   :  { %1098 = vsyncadd [#allocation4], 4294967280 }
0x1487   :  { %857 = vsyncpa [#allocation3], 1 }
0x1488   :  { %858 = vsyncpa [#allocation6], 1 }
0x1489   :  { %859 = vsyncpa [#allocation4], 1 }

</bundles_post_ra>
